<compile_context>
chip_gen: v7x
topology: tpu7x:2x2x1
jax: 0.10.0
libtpu: 0.0.40
codegen_flags: <defaults>
</compile_context>

<pallas_src>
import jax
import jax.numpy as jnp
from jax.experimental import pallas as pl
from jax.experimental.pallas import tpu as pltpu


_LANE_CHOICES = (512, 256, 128)          # lane-dense last dims (multiples of 128)
_TARGET_TILE_BYTES = 4 * 1024 * 1024     # ~4 MiB/tile amortizes ~0.35us per step
_VMEM_LIMIT_BYTES = 32 * 1024 * 1024     # in+out double-buffered 4 MiB tiles + slack


def _identity_kernel(x_ref, o_ref):
    # Pure copy: forward(x) = x.  No compute; HBM DMA is the only cost.
    o_ref[...] = x_ref[...]


def identity(x):
    """Identity.forward(x) == x.  The fastest kernel is no kernel."""
    return x


def _tile_rows(rows: int, lane: int, itemsize: int) -> int:
    """Pick the row-tile size: ~4 MiB tiles, multiple of 8, and >= 2 grid tiles
    whenever rows > 8 so both v7x TensorCores get work."""
    if rows <= 8:
        return rows                                    # single full-extent block
    target = max(8, (_TARGET_TILE_BYTES // (lane * itemsize)) // 8 * 8)
    half = ((pl.cdiv(rows, 2) + 7) // 8) * 8           # ceil(rows/2) rounded to 8
    return max(8, min(target, half))


def identity_pallas(x):
    """Identity via a tiled, pipelined, lane-dense Pallas copy (benchmark path)."""
    orig_shape = x.shape
    total = x.size
    if total == 0:
        return x

    itemsize = jnp.dtype(x.dtype).itemsize

    # Lane width that divides the element count exactly -> no pad/concat/slice.
    lane = next((l for l in _LANE_CHOICES if total % l == 0), None)
    if lane is None:
        # Padding would add 2 full-tensor HBM copies around the kernel; for an
        # Identity the value-exact answer is simply x.
        return x

    rows = total // lane
    x2d = x.reshape(rows, lane)            # layout-level reshape, no HBM traffic
    tile_rows = _tile_rows(rows, lane, itemsize)
    grid = (pl.cdiv(rows, tile_rows),)

    out2d = pl.pallas_call(
        _identity_kernel,
        out_shape=jax.ShapeDtypeStruct((rows, lane), x2d.dtype),
        grid=grid,
        in_specs=[pl.BlockSpec((tile_rows, lane), lambda i: (i, 0))],
        out_specs=pl.BlockSpec((tile_rows, lane), lambda i: (i, 0)),
        compiler_params=pltpu.CompilerParams(
            dimension_semantics=("parallel",),
            vmem_limit_bytes=_VMEM_LIMIT_BYTES,
        ),
        cost_estimate=pl.CostEstimate(
            flops=0,
            transcendentals=0,
            bytes_accessed=2 * total * itemsize,
        ),
    )(x2d)

    return out2d.reshape(orig_shape)


if __name__ == "__main__":
    key = jax.random.PRNGKey(0)
    x = jax.random.normal(key, (2, 4, 16, 16), dtype=jnp.float32)  # NCHW

    # Production path: no kernel at all.
    y_fast = jax.block_until_ready(identity(x))
    assert y_fast.shape == x.shape and y_fast.dtype == x.dtype
    assert jnp.array_equal(y_fast, x), "identity (short-circuit) differs from input"

    # Pallas demonstration/benchmark path.
    identity_pallas_jit = jax.jit(identity_pallas)
    y = jax.block_until_ready(identity_pallas_jit(x))

    assert y.shape == x.shape, f"shape mismatch: {y.shape} vs {x.shape}"
    assert y.dtype == x.dtype, f"dtype mismatch: {y.dtype} vs {x.dtype}"
    assert jnp.array_equal(y, x), "identity (pallas) output differs from input"

    print("KERNEL_OK")
</pallas_src>

<mosaic_0001>
module attributes {stable_mosaic.version = 11 : i64} {
  func.func @_identity_kernel(%arg0: i32, %arg1: memref<4x512xf32, #tpu.memory_space<vmem>>, %arg2: memref<4x512xf32, #tpu.memory_space<vmem>>) attributes {dimension_semantics = [#tpu.dimension_semantics<parallel>], iteration_bounds = array<i64: 1>, scalar_prefetch = 0 : i64, scratch_operands = 0 : i64, tpu.core_type = #tpu.core_type<tc>, window_params = [{transform_indices = @transform_0, window_bounds = array<i64: 4, 512>}, {transform_indices = @transform_1, window_bounds = array<i64: 4, 512>}]} {
    %c0 = arith.constant 0 : index
    %c0_0 = arith.constant 0 : index
    %0 = vector.load %arg1[%c0, %c0_0] : memref<4x512xf32, #tpu.memory_space<vmem>>, vector<4x512xf32>
    %c0_1 = arith.constant 0 : index
    %c0_2 = arith.constant 0 : index
    %1 = vector.load %arg2[%c0_1, %c0_2] : memref<4x512xf32, #tpu.memory_space<vmem>>, vector<4x512xf32>
    tpu.vector_store %arg2[%c0_1, %c0_2], %0 {strides = array<i32>} : memref<4x512xf32, #tpu.memory_space<vmem>>, vector<4x512xf32>,
    return
  }
  func.func @transform_0(%arg0: i32) -> (i32, i32) {
    %c0_i32 = arith.constant 0 : i32
    %c0_i32_0 = arith.constant 0 : i32
    return %arg0, %c0_i32 : i32, i32
  }
  func.func @transform_1(%arg0: i32) -> (i32, i32) {
    %c0_i32 = arith.constant 0 : i32
    %c0_i32_0 = arith.constant 0 : i32
    return %arg0, %c0_i32 : i32, i32
  }
}

</mosaic_0001>

<bundles_post_ra>
// kernel: identity_pallas.1
= control target key start
LH: loop header
LB: loop body
LE: loop exit
PB: predicated region body
PF: predicated region fallthrough
CT: control target
= control target key end

     0   :  { %s38_s0 = inlined_call_operand.vmem [shape: f32[4,512], index: 0, kind: input, shape index: {}]   ;;  %s39_s1 = inlined_call_operand.vmem [shape: f32[4,512], index: 1, kind: output, shape index: {}]  }
   0x1   :  { %v8_v0 = vld [vmem:[%s38_s0] sm:$0xff]  ;;  %v9_v1 = vld [vmem:[%s38_s0 + $0x8] sm:$0xff] }
   0x2   :  { %10 = vst [vmem:[%s39_s1] sm:$0xff] %v8_v0  ;;  %11 = vst [vmem:[%s39_s1 + $0x8] sm:$0xff] %v9_v1 }

</bundles_post_ra>
